<compile_context>
chip_gen: v7x
topology: tpu7x:2x2x1
jax: 0.10.0
libtpu: 0.0.40
codegen_flags: <defaults>
</compile_context>

<pallas_src>
import math

import jax
import jax.numpy as jnp
from jax.experimental import pallas as pl
from jax.experimental.pallas import tpu as pltpu

IN_FEATURES = 3
OUT_FEATURES = 8

_C1 = 0.7978845608028654          # sqrt(2/pi)
_A = 0.5 * _C1                    # coefficient of v1 inside tanh
_B = 0.044715 * _C1               # coefficient of v1^3 inside tanh

POSITIONS_PER_ROW = 32            # P: positions packed per lane-row
_KIN = IN_FEATURES * POSITIONS_PER_ROW    # 96  input lanes per row
_NOUT = OUT_FEATURES * POSITIONS_PER_ROW  # 256 output lanes per row


def _fused_linear_gelu_kernel(x_ref, w_hi_ref, w_lo_ref, b_ref, o_ref):
    # x_ref: (R, 96) f32   w_*_ref: (96, 256) bf16   b_ref: (1, 256) f32
    # o_ref: (R, 256) f32  -- already in row-major (pos, feature) interleaved order.
    x = x_ref[...]                                        # (R, 96) f32

    # hi/lo bf16 split of the activations (weights are pre-split on the host).
    x_hi = x.astype(jnp.bfloat16)
    x_lo = (x - x_hi.astype(jnp.float32)).astype(jnp.bfloat16)

    w_hi = w_hi_ref[...]
    w_lo = w_lo_ref[...]

    # 3-pass bf16 matmul ~= exact f32 linear layer, fused with the output interleave.
    v1 = jnp.dot(x_hi, w_hi, preferred_element_type=jnp.float32)
    v1 = v1 + jnp.dot(x_lo, w_hi, preferred_element_type=jnp.float32)
    v1 = v1 + jnp.dot(x_hi, w_lo, preferred_element_type=jnp.float32)
    v1 = v1 + b_ref[...]                                  # (R, 256) f32

    # Restructured tanh-GELU epilogue (identical math to the module):
    #   inner = (0.044715*v1^3 + 0.5*v1) * sqrt(2/pi) = v1*(A + B*v1^2)
    #   out   = 0.5*v1 * (tanh(inner) + 1)
    half = v1 * 0.5
    inner = v1 * (_A + _B * (v1 * v1))
    o_ref[...] = (half * (jnp.tanh(inner) + 1.0)).astype(o_ref.dtype)


def fused_forward(x, weight, bias, *, target_tile_rows=2048):
    """x: (..., 3) float32. weight: (8, 3) (torch layout). bias: (8,).

    Returns (..., 8) float32, matching Linear(3, 8) + tanh-GELU epilogue.
    """
    lead_shape = x.shape[:-1]
    assert x.shape[-1] == IN_FEATURES
    n = math.prod(lead_shape) if lead_shape else 1
    P = POSITIONS_PER_ROW

    # Pad the position count to a multiple of P (rare path; costs one copy).
    n_pad = ((n + P - 1) // P) * P
    x_flat = x.reshape(n, IN_FEATURES)
    if n_pad != n:
        x_flat = jnp.pad(x_flat, ((0, n_pad - n), (0, 0)))
    rows = n_pad // P

    # Free reshape of the contiguous buffer: row r holds positions [32r, 32r+32),
    # column 3b+k = feature k of local position b.
    x_view = x_flat.reshape(rows, _KIN)                    # (rows, 96)

    # Host-side constant folding: block-diagonal weight that maps lane 3b+k to
    # lane 8b+f with value W[f, k] -> matmul output is already interleaved.
    w_big = jnp.kron(jnp.eye(P, dtype=jnp.float32), weight.T)       # (96, 256)
    w_hi = w_big.astype(jnp.bfloat16)
    w_lo = (w_big - w_hi.astype(jnp.float32)).astype(jnp.bfloat16)
    b_big = jnp.tile(bias, P).reshape(1, _NOUT)                      # (1, 256)

    # Tile selection: big tiles to amortize per-step overhead, >=2 blocks when
    # possible (v7x megacore), row count a multiple of 8 (sublane constraint).
    if rows <= 16:
        tile_rows = rows                      # single full block
    else:
        half_rows = pl.cdiv(rows, 2)
        tile_rows = min(target_tile_rows, ((half_rows + 7) // 8) * 8)
    grid = (pl.cdiv(rows, tile_rows),)        # trailing partial block is masked;
                                              # each output row depends only on its own input row.

    out_view = pl.pallas_call(
        _fused_linear_gelu_kernel,
        out_shape=jax.ShapeDtypeStruct((rows, _NOUT), jnp.float32),
        grid_spec=pltpu.PrefetchScalarGridSpec(
            num_scalar_prefetch=0,
            grid=grid,
            in_specs=[
                pl.BlockSpec((tile_rows, _KIN), lambda i: (i, 0)),
                pl.BlockSpec((_KIN, _NOUT), lambda i: (0, 0)),   # resident
                pl.BlockSpec((_KIN, _NOUT), lambda i: (0, 0)),   # resident
                pl.BlockSpec((1, _NOUT), lambda i: (0, 0)),      # resident
            ],
            out_specs=pl.BlockSpec((tile_rows, _NOUT), lambda i: (i, 0)),
        ),
        compiler_params=pltpu.CompilerParams(
            dimension_semantics=("parallel",)),
    )(x_view, w_hi, w_lo, b_big)

    out = out_view.reshape(n_pad, OUT_FEATURES)            # free reshape
    if n_pad != n:
        out = out[:n]
    return out.reshape(*lead_shape, OUT_FEATURES)


def init_linear_params(key):
    """Deterministic init mimicking torch.nn.Linear(3, 8) (uniform +-1/sqrt(fan_in))."""
    kw, kb = jax.random.split(key)
    bound = 1.0 / (IN_FEATURES ** 0.5)
    weight = jax.random.uniform(kw, (OUT_FEATURES, IN_FEATURES),
                                dtype=jnp.float32, minval=-bound, maxval=bound)
    bias = jax.random.uniform(kb, (OUT_FEATURES,),
                              dtype=jnp.float32, minval=-bound, maxval=bound)
    return weight, bias


def reference_forward(x, weight, bias):
    # Exact f32 reference (elementwise contraction avoids any XLA matmul
    # precision ambiguity), literal translation of the module's op chain.
    v1 = (x[..., None, :] * weight).sum(-1) + bias
    v2 = v1 * 0.5
    v3 = v1 * v1 * v1 * 0.044715
    v4 = v3 + v2
    v5 = v4 * _C1
    v6 = jnp.tanh(v5)
    v9 = v6 + 1.0
    return v2 * v9


if __name__ == "__main__":
    key = jax.random.PRNGKey(0)
    k_x, k_p = jax.random.split(key)

    # Small shape consistent with the module: (..., C=3), C is the linear dim.
    x = jax.random.normal(k_x, (2, 32, 16, IN_FEATURES), dtype=jnp.float32)
    weight, bias = init_linear_params(k_p)

    fwd = jax.jit(fused_forward)
    out = jax.block_until_ready(fwd(x, weight, bias))

    ref = reference_forward(x, weight, bias)
    assert out.shape == (2, 32, 16, OUT_FEATURES)
    err = float(jnp.max(jnp.abs(out - ref)))
    assert jnp.allclose(out, ref, atol=2e-4, rtol=2e-4), err

    print("KERNEL_OK")
</pallas_src>

<mosaic_0001>
module attributes {stable_mosaic.version = 11 : i64} {
  func.func @_fused_linear_gelu_kernel(%arg0: i32, %arg1: memref<16x96xf32, #tpu.memory_space<vmem>>, %arg2: memref<96x256xbf16, #tpu.memory_space<vmem>>, %arg3: memref<96x256xbf16, #tpu.memory_space<vmem>>, %arg4: memref<1x256xf32, #tpu.memory_space<vmem>>, %arg5: memref<16x256xf32, #tpu.memory_space<vmem>>) attributes {dimension_semantics = [#tpu.dimension_semantics<parallel>], iteration_bounds = array<i64: 2>, scalar_prefetch = 0 : i64, scratch_operands = 0 : i64, tpu.core_type = #tpu.core_type<tc>, window_params = [{transform_indices = @transform_0, window_bounds = array<i64: 16, 96>}, {pipeline_mode = #tpu.pipeline_mode<synchronous>, transform_indices = @transform_1, window_bounds = array<i64: 96, 256>}, {pipeline_mode = #tpu.pipeline_mode<synchronous>, transform_indices = @transform_2, window_bounds = array<i64: 96, 256>}, {pipeline_mode = #tpu.pipeline_mode<synchronous>, transform_indices = @transform_3, window_bounds = array<i64: 1, 256>}, {transform_indices = @transform_4, window_bounds = array<i64: 16, 256>}]} {
    %c0 = arith.constant 0 : index
    %c0_0 = arith.constant 0 : index
    %0 = vector.load %arg1[%c0, %c0_0] : memref<16x96xf32, #tpu.memory_space<vmem>>, vector<16x96xf32>
    %1 = arith.truncf %0 : vector<16x96xf32> to vector<16x96xbf16>
    %2 = arith.extf %1 : vector<16x96xbf16> to vector<16x96xf32>
    %3 = arith.subf %0, %2 : vector<16x96xf32>
    %4 = arith.truncf %3 : vector<16x96xf32> to vector<16x96xbf16>
    %c0_1 = arith.constant 0 : index
    %c0_2 = arith.constant 0 : index
    %5 = vector.load %arg2[%c0_1, %c0_2] : memref<96x256xbf16, #tpu.memory_space<vmem>>, vector<96x256xbf16>
    %c0_3 = arith.constant 0 : index
    %c0_4 = arith.constant 0 : index
    %6 = vector.load %arg3[%c0_3, %c0_4] : memref<96x256xbf16, #tpu.memory_space<vmem>>, vector<96x256xbf16>
    %cst = arith.constant dense<0.000000e+00> : vector<16x256xf32>
    %7 = tpu.matmul %1, %5, %cst {dimension_numbers = #tpu.dot_dimension_numbers<[1], [0], [0], [1], [0, 0, 1, 1], [], []>} : vector<16x96xbf16>, vector<96x256xbf16>, vector<16x256xf32> -> vector<16x256xf32>
    %cst_5 = arith.constant dense<0.000000e+00> : vector<16x256xf32>
    %8 = tpu.matmul %4, %5, %cst_5 {dimension_numbers = #tpu.dot_dimension_numbers<[1], [0], [0], [1], [0, 0, 1, 1], [], []>} : vector<16x96xbf16>, vector<96x256xbf16>, vector<16x256xf32> -> vector<16x256xf32>
    %9 = arith.addf %7, %8 : vector<16x256xf32>
    %cst_6 = arith.constant dense<0.000000e+00> : vector<16x256xf32>
    %10 = tpu.matmul %1, %6, %cst_6 {dimension_numbers = #tpu.dot_dimension_numbers<[1], [0], [0], [1], [0, 0, 1, 1], [], []>} : vector<16x96xbf16>, vector<96x256xbf16>, vector<16x256xf32> -> vector<16x256xf32>
    %11 = arith.addf %9, %10 : vector<16x256xf32>
    %c0_7 = arith.constant 0 : index
    %c0_8 = arith.constant 0 : index
    %12 = vector.load %arg4[%c0_7, %c0_8] : memref<1x256xf32, #tpu.memory_space<vmem>>, vector<1x256xf32>
    %13 = vector.broadcast %12 : vector<1x256xf32> to vector<16x256xf32>
    %14 = arith.addf %11, %13 : vector<16x256xf32>
    %cst_9 = arith.constant 5.000000e-01 : f32
    %15 = vector.broadcast %cst_9 : f32 to vector<16x256xf32>
    %16 = arith.mulf %14, %15 : vector<16x256xf32>
    %17 = arith.mulf %14, %14 : vector<16x256xf32>
    %cst_10 = arith.constant 0.0356774069 : f32
    %18 = vector.broadcast %cst_10 : f32 to vector<16x256xf32>
    %19 = arith.mulf %18, %17 : vector<16x256xf32>
    %cst_11 = arith.constant 0.398942292 : f32
    %20 = vector.broadcast %cst_11 : f32 to vector<16x256xf32>
    %21 = arith.addf %20, %19 : vector<16x256xf32>
    %22 = arith.mulf %14, %21 : vector<16x256xf32>
    %23 = math.tanh %22 : vector<16x256xf32>
    %cst_12 = arith.constant 1.000000e+00 : f32
    %24 = vector.broadcast %cst_12 : f32 to vector<16x256xf32>
    %25 = arith.addf %23, %24 : vector<16x256xf32>
    %26 = arith.mulf %16, %25 : vector<16x256xf32>
    %c0_13 = arith.constant 0 : index
    %c0_14 = arith.constant 0 : index
    %27 = vector.load %arg5[%c0_13, %c0_14] : memref<16x256xf32, #tpu.memory_space<vmem>>, vector<16x256xf32>
    tpu.vector_store %arg5[%c0_13, %c0_14], %26 {strides = array<i32>} : memref<16x256xf32, #tpu.memory_space<vmem>>, vector<16x256xf32>,
    return
  }
  func.func @transform_0(%arg0: i32) -> (i32, i32) {
    %c0_i32 = arith.constant 0 : i32
    %c0_i32_0 = arith.constant 0 : i32
    return %arg0, %c0_i32 : i32, i32
  }
  func.func @transform_1(%arg0: i32) -> (i32, i32) {
    %c0_i32 = arith.constant 0 : i32
    %c0_i32_0 = arith.constant 0 : i32
    %c0_i32_1 = arith.constant 0 : i32
    return %c0_i32, %c0_i32_0 : i32, i32
  }
  func.func @transform_2(%arg0: i32) -> (i32, i32) {
    %c0_i32 = arith.constant 0 : i32
    %c0_i32_0 = arith.constant 0 : i32
    %c0_i32_1 = arith.constant 0 : i32
    return %c0_i32, %c0_i32_0 : i32, i32
  }
  func.func @transform_3(%arg0: i32) -> (i32, i32) {
    %c0_i32 = arith.constant 0 : i32
    %c0_i32_0 = arith.constant 0 : i32
    %c0_i32_1 = arith.constant 0 : i32
    return %c0_i32, %c0_i32_0 : i32, i32
  }
  func.func @transform_4(%arg0: i32) -> (i32, i32) {
    %c0_i32 = arith.constant 0 : i32
    %c0_i32_0 = arith.constant 0 : i32
    return %arg0, %c0_i32 : i32, i32
  }
}

</mosaic_0001>

<bundles_post_ra>
// kernel: tile.8
= control target key start
LH: loop header
LB: loop body
LE: loop exit
PB: predicated region body
PF: predicated region fallthrough
CT: control target
= control target key end

     0   :  { %s40_s0 = inlined_call_operand.vmem [shape: f32[8], index: 0, kind: input, shape index: {}]   ;;  %s41_s1 = inlined_call_operand.vmem [shape: f32[32,8], index: 1, kind: output, shape index: {}]  }
   0x1   :  { %v4_v0 = vld [vmem:[%s40_s0] ss:$0 sm:$0xff] }
   0x2   :  { %5 = vst [vmem:[%s41_s1] sm:$0xff] %v4_v0  ;;  %12 = vst [vmem:[%s41_s1 + $0x8] sm:$0xff] %v4_v0 }
   0x3   :  { %13 = vst [vmem:[%s41_s1 + $0x10] sm:$0xff] %v4_v0  ;;  %14 = vst [vmem:[%s41_s1 + $0x18] sm:$0xff] %v4_v0 }

// kernel: tile.9
= control target key start
LH: loop header
LB: loop body
LE: loop exit
PB: predicated region body
PF: predicated region fallthrough
CT: control target
= control target key end

     0   :  { %s7_s6 = smov 3  ;;  %s21_s9 = smov 3  ;;  %vm4_vm0 = vcmask 64512   ;;  %vm11_vm1 = vcmask 1048512   ;;  %vm18_vm2 = vcmask 982912   ;;  %vm25_vm3 = vcmask 917312   ;;  %s232_s0 = inlined_call_operand.vmem [shape: f32[32,8], index: 0, kind: input, shape index: {}]   ;;  %s233_s1 = inlined_call_operand.vmem [shape: f32[1,256], index: 1, kind: output, shape index: {}]  }
   0x1   :  { %v122_v0 = vld [vmem:[%s232_s0 + $0xf] ss:$16 sm:%s7_s6]   ;;  %s153_s10 = smov 120   ;;  %v124_v1 = vld [vmem:[%s232_s0 + $0xd] ss:$16 sm:%s21_s9]   ;;  %s14_s13 = smov 3 }
   0x2   :  { %9 = vrot.lane.b32.xlu0 %v122_v0, %s153_s10  ;;  %s154_s14 = smov 104   ;;  %v123_v2 = vld [vmem:[%s232_s0 + $0xe] ss:$16 sm:%s14_s13]   ;;  %s28_s17 = smov 3  ;;  %vm32_vm4 = vcmask 851712   ;;  %vm39_vm5 = vcmask 786112  }
   0x3   :  { %23 = vrot.lane.b32.xlu1 %v124_v1, %s154_s14  ;;  %v125_v3 = vld [vmem:[%s232_s0 + $0xc] ss:$16 sm:%s28_s17]   ;;  %s35_s20 = smov 3  ;;  %s42_s21 = smov 3  ;;  %vm46_vm6 = vcmask 720512   ;;  %vm53_vm7 = vcmask 654912  }
   0x4   :  { %s155_s22 = smov 112   ;;  %s156_s23 = smov 96   ;;  %v126_v4 = vld [vmem:[%s232_s0 + $0xb] ss:$16 sm:%s35_s20]   ;;  %v127_v5 = vld [vmem:[%s232_s0 + $0xa] ss:$16 sm:%s42_s21]  }
   0x5   :  { %s49_s28 = smov 3  ;;  %s56_s29 = smov 3  ;;  %vm60_vm8 = vcmask 589312   ;;  %vm67_vm9 = vcmask 523712   ;;  %vm74_vm10 = vcmask 458112   ;;  %vm81_vm11 = vcmask 392512  }
   0x6   :  { %16 = vrot.lane.b32.xlu0 %v123_v2, %s155_s22  ;;  %s157_s30 = smov 88   ;;  %s158_s2 = smov 80   ;;  %v128_v6 = vld [vmem:[%s232_s0 + $0x9] ss:$16 sm:%s49_s28]   ;;  %vm88_vm12 = vcmask 326912   ;;  %vm95_vm13 = vcmask 261312  }
   0x7   :  { %30 = vrot.lane.b32.xlu1 %v125_v3, %s156_s23  ;;  %v129_v7 = vld [vmem:[%s232_s0 + $0x8] ss:$16 sm:%s56_s29]   ;;  %s63_s7 = smov 3  ;;  %s70_s8 = smov 3  ;;  %vm102_vm14 = vcmask 195712   ;;  %vm109_vm15 = vcmask 130112  }
   0x8   :  { %s159_s9 = smov 72   ;;  %s160_s10 = smov 64   ;;  %v130_v8 = vld [vmem:[%s232_s0 + $0x7] ss:$16 sm:%s63_s7]   ;;  %v131_v9 = vld [vmem:[%s232_s0 + $0x6] ss:$16 sm:%s70_s8]  }
   0x9   :  { %s2_s13 = smov 3  ;;  %s77_s16 = smov 3 }
   0xa   :  { %37 = vrot.lane.b32.xlu0 %v126_v4, %s157_s30  ;;  %v3_v10 = vld [vmem:[%s232_s0] ss:$16 sm:%s2_s13]   ;;  %s84_s19 = smov 3  ;;  %s161_s20 = smov 56  }
   0xb   :  { %44 = vrot.lane.b32.xlu1 %v127_v5, %s158_s2  ;;  %5 = vst.msk [vmem:[#allocation0] ss:$8 sm:$0x3] %vm4_vm0, %v3_v10   ;;  %s162_s21 = smov 48   ;;  %v132_v11 = vld [vmem:[%s232_s0 + $0x5] ss:$16 sm:%s77_s16]  }
   0xc   :  { %v133_v12 = vld [vmem:[%s232_s0 + $0x4] ss:$16 sm:%s84_s19]   ;;  %s91_s26 = smov 3  ;;  %s98_s27 = smov 3 }
   0xd   :  { %s163_s28 = smov 40   ;;  %s164_s29 = smov 32   ;;  %v134_v13 = vld [vmem:[%s232_s0 + $0x3] ss:$16 sm:%s91_s26]   ;;  %v135_v14 = vld [vmem:[%s232_s0 + $0x2] ss:$16 sm:%s98_s27]  }
   0xe   :  { %51 = vrot.lane.b32.xlu0 %v128_v6, %s159_s9  ;;  %s105_s5 = smov 3  ;;  %s165_s6 = smov 24  }
   0xf   :  { %58 = vrot.lane.b32.xlu1 %v129_v7, %s160_s10  ;;  %s166_s7 = smov 16   ;;  %v136_v15 = vld [vmem:[%s232_s0 + $0x1] ss:$16 sm:%s105_s5]   ;;  %s167_s0 = smov 8  }
  0x12   :  { %65 = vrot.lane.b32.xlu0 %v130_v8, %s161_s20 }
  0x13   :  { %72 = vrot.lane.b32.xlu1 %v131_v9, %s162_s21 }
  0x16   :  { %79 = vrot.lane.b32.xlu0 %v132_v11, %s163_s28 }
  0x17   :  { %86 = vrot.lane.b32.xlu1 %v133_v12, %s164_s29 }
  0x1a   :  { %93 = vrot.lane.b32.xlu0 %v134_v13, %s165_s6 }
  0x1b   :  { %100 = vrot.lane.b32.xlu1 %v135_v14, %s166_s7 }
  0x1e   :  { %107 = vrot.lane.b32.xlu0 %v136_v15, %s167_s0 }
  0x74   :  { %v10_v16 = vpop.permute.xlu0 %9  }
  0x75   :  { %12 = vst.msk [vmem:[#allocation0] ss:$8 sm:$0x3] %vm11_vm1, %v10_v16   ;;  %v24_v17 = vpop.permute.xlu1 %23  }
  0x78   :  { %v17_v18 = vpop.permute.xlu0 %16  }
  0x79   :  { %19 = vst.msk [vmem:[#allocation0] ss:$8 sm:$0x3] %vm18_vm2, %v17_v18   ;;  %v31_v19 = vpop.permute.xlu1 %30  }
  0x7a   :  { %26 = vst.msk [vmem:[#allocation0] ss:$8 sm:$0x3] %vm25_vm3, %v24_v17  }
  0x7b   :  { %33 = vst.msk [vmem:[#allocation0] ss:$8 sm:$0x3] %vm32_vm4, %v31_v19  }
  0x7c   :  { %v38_v20 = vpop.permute.xlu0 %37  }
  0x7d   :  { %40 = vst.msk [vmem:[#allocation0] ss:$8 sm:$0x3] %vm39_vm5, %v38_v20   ;;  %v45_v21 = vpop.permute.xlu1 %44  }
  0x7e   :  { %47 = vst.msk [vmem:[#allocation0] ss:$8 sm:$0x3] %vm46_vm6, %v45_v21  }
  0x80   :  { %v52_v22 = vpop.permute.xlu0 %51  }
  0x81   :  { %54 = vst.msk [vmem:[#allocation0] ss:$8 sm:$0x3] %vm53_vm7, %v52_v22   ;;  %v59_v23 = vpop.permute.xlu1 %58  }
  0x82   :  { %61 = vst.msk [vmem:[#allocation0] ss:$8 sm:$0x3] %vm60_vm8, %v59_v23  }
  0x84   :  { %v66_v24 = vpop.permute.xlu0 %65  }
  0x85   :  { %68 = vst.msk [vmem:[#allocation0] ss:$8 sm:$0x3] %vm67_vm9, %v66_v24   ;;  %v73_v25 = vpop.permute.xlu1 %72  }
  0x86   :  { %75 = vst.msk [vmem:[#allocation0] ss:$8 sm:$0x3] %vm74_vm10, %v73_v25  }
  0x88   :  { %v80_v26 = vpop.permute.xlu0 %79  }
  0x89   :  { %82 = vst.msk [vmem:[#allocation0] ss:$8 sm:$0x3] %vm81_vm11, %v80_v26   ;;  %v87_v27 = vpop.permute.xlu1 %86  }
  0x8a   :  { %89 = vst.msk [vmem:[#allocation0] ss:$8 sm:$0x3] %vm88_vm12, %v87_v27  }
  0x8c   :  { %v94_v28 = vpop.permute.xlu0 %93  }
  0x8d   :  { %96 = vst.msk [vmem:[#allocation0] ss:$8 sm:$0x3] %vm95_vm13, %v94_v28   ;;  %v101_v29 = vpop.permute.xlu1 %100  }
  0x8e   :  { %103 = vst.msk [vmem:[#allocation0] ss:$8 sm:$0x3] %vm102_vm14, %v101_v29  }
  0x90   :  { %v108_v30 = vpop.permute.xlu0 %107  }
  0x91   :  { %110 = vst.msk [vmem:[#allocation0] ss:$8 sm:$0x3] %vm109_vm15, %v108_v30  }
  0x98   :  { %v114_v31 = vld [vmem:[#allocation0] sm:$0x1]  ;;  %v118_v32 = vld [vmem:[#allocation0 + $0x8] sm:$0x1] }
  0x99   :  { %116 = vst [vmem:[%s233_s1] sm:$0x1] %v114_v31  ;;  %137 = vst [vmem:[%s233_s1 + $0x1] sm:$0x1] %v118_v32 }

// kernel: fused_forward.1
= control target key start
LH: loop header
LB: loop body
LE: loop exit
PB: predicated region body
PF: predicated region fallthrough
CT: control target
= control target key end

     0   :  { %s741_s15 = smov 0   ;;  %s840_s0 = inlined_call_operand.vmem [shape: f32[32,96], index: 0, kind: input, shape index: {}]   ;;  %s841_s1 = inlined_call_operand.vmem [shape: bf16[96,256], index: 1, kind: input, shape index: {}]   ;;  %s842_s2 = inlined_call_operand.vmem [shape: bf16[96,256], index: 2, kind: input, shape index: {}]   ;;  %s843_s3 = inlined_call_operand.vmem [shape: f32[1,256], index: 3, kind: input, shape index: {}]   ;;  %s844_s4 = inlined_call_operand.vmem [shape: f32[32,256], index: 4, kind: output, shape index: {}]  }
   0x1 LB: > { %s606_s16 = sadd.s32 4294967295, %s713_s15   ;;  %p610_p0 = scmp.ge.s32.totalorder %s713_s15, 1  ;;  %s713_s15 = sphi %s741_s15, %s14_s15  }
   0x2   : > { %p163_p1 = scmp.lt.s32.totalorder %s713_s15, 3 }
   0x4   : > { %p164_p2 = pnand %p610_p0, %p163_p1 }
   0x5   : > { %v663_v0 = vld [vmem:[%s841_s1 + $0x4] ss:$8 sps:$4 sm:$0xff] (!%p164_p2)   ;;  %s611_s19 = sshll.u32 (!%p164_p2), %s606_s16, 1  ;;  %v665_v1 = vld [vmem:[%s841_s1] ss:$8 sps:$4 sm:$0xff] (!%p164_p2)   ;;  %v715_v2 = vmov (!%p164_p2), 0   ;;  %v498_v37 = vlaneseq (!%p164_p2) }
   0x6   : > { %167 = sbr.rel (%p164_p2) target bundleno = 298 (0x12a), region = 36  ;;  %378 = vmatprep.mubr.bf16.mxu0 (!%p164_p2), %v715_v2  ;;  %p191_p3 = scmp.lt.s32.totalorder (!%p164_p2), %s611_s19, 3  ;;  %332 = vmatprep.mubr.bf16.mxu1 (!%p164_p2), %v715_v2  ;;  %v666_v3 = vld [vmem:[%s841_s1 + $0x14] ss:$8 sps:$4 sm:$0xff] (!%p164_p2)   ;;  %v668_v4 = vld [vmem:[%s841_s1 + $0x10] ss:$8 sps:$4 sm:$0xff] (!%p164_p2)  }
   0x7   : > { %346 = vmatprep.subr.bf16.mxu0 (!%p164_p2), %v663_v0  ;;  %300 = vmatprep.subr.bf16.mxu1 (!%p164_p2), %v663_v0  ;;  %v669_v5 = vld [vmem:[%s841_s1 + $0x24] ss:$8 sps:$4 sm:$0xff] (!%p164_p2)   ;;  %v671_v6 = vld [vmem:[%s841_s1 + $0x20] ss:$8 sps:$4 sm:$0xff] (!%p164_p2)   ;;  %v672_v7 = vld [vmem:[%s841_s1 + $0x34] ss:$8 sps:$4 sm:$0xff] (!%p164_p2)  }
   0x8   : > { %347 = vmatpush1.bf16.msra.mxu0 (!%p164_p2), %v665_v1  ;;  %301 = vmatpush1.bf16.msra.mxu1 (!%p164_p2), %v665_v1  ;;  %v674_v10 = vld [vmem:[%s841_s1 + $0x30] ss:$8 sps:$4 sm:$0xff] (!%p164_p2)   ;;  %v675_v11 = vld [vmem:[%s841_s1 + $0x44] ss:$8 sps:$4 sm:$0xff] (!%p164_p2)   ;;  %v677_v15 = vld [vmem:[%s841_s1 + $0x40] ss:$8 sps:$4 sm:$0xff] (!%p164_p2)  }
   0x9   : > { %348 = vmatprep.subr.bf16.mxu0 (!%p164_p2), %v666_v3  ;;  %302 = vmatprep.subr.bf16.mxu1 (!%p164_p2), %v666_v3  ;;  %v678_v16 = vld [vmem:[%s841_s1 + $0x54] ss:$8 sps:$4 sm:$0xff] (!%p164_p2)   ;;  %v680_v19 = vld [vmem:[%s841_s1 + $0x50] ss:$8 sps:$4 sm:$0xff] (!%p164_p2)   ;;  %v683_v20 = vld [vmem:[%s842_s2 + $0x4] ss:$8 sps:$4 sm:$0xff] (!%p164_p2)  }
   0xa   : > { %v681_v22 = vld [vmem:[%s842_s2] ss:$8 sps:$4 sm:$0xff] (!%p164_p2)   ;;  %vm296_vm0 = vcmask (!%p164_p2), 785408   ;;  %v686_v23 = vld [vmem:[%s842_s2 + $0x14] ss:$8 sps:$4 sm:$0xff] (!%p164_p2)   ;;  %v499_v38 = vshrl.u32 (!%p164_p2), %v498_v37, 7 }
   0xb   : > { %v684_v24 = vld [vmem:[%s842_s2 + $0x10] ss:$8 sps:$4 sm:$0xff] (!%p164_p2)   ;;  %v689_v25 = vld [vmem:[%s842_s2 + $0x24] ss:$8 sps:$4 sm:$0xff] (!%p164_p2)   ;;  %v687_v26 = vld [vmem:[%s842_s2 + $0x20] ss:$8 sps:$4 sm:$0xff] (!%p164_p2)  }
   0xc   : > { %349 = vmatpush1.bf16.msra.mxu0 (!%p164_p2), %v668_v4  ;;  %303 = vmatpush1.bf16.msra.mxu1 (!%p164_p2), %v668_v4  ;;  %v692_v27 = vld [vmem:[%s842_s2 + $0x34] ss:$8 sps:$4 sm:$0xff] (!%p164_p2)   ;;  %v690_v28 = vld [vmem:[%s842_s2 + $0x30] ss:$8 sps:$4 sm:$0xff] (!%p164_p2)   ;;  %v695_v29 = vld [vmem:[%s842_s2 + $0x44] ss:$8 sps:$4 sm:$0xff] (!%p164_p2)  }
   0xd   : > { %s846_s19 = smov (!%p191_p3, %s611_s19), 3  ;;  %350 = vmatprep.subr.bf16.mxu0 %v669_v5  ;;  %304 = vmatprep.subr.bf16.mxu1 %v669_v5  ;;  %v693_v30 = vld [vmem:[%s842_s2 + $0x40] ss:$8 sps:$4 sm:$0xff]   ;;  %v698_v31 = vld [vmem:[%s842_s2 + $0x54] ss:$8 sps:$4 sm:$0xff]   ;;  %v500_v39 = vsub.s32 0, %v499_v38 }
   0xe   : > { %s612_s28 = sshll.u32 %s846_s19, 3  ;;  %v696_v32 = vld [vmem:[%s842_s2 + $0x50] ss:$8 sps:$4 sm:$0xff]   ;;  %v496_v40 = vld [vmem:[%s843_s3] sm:$0x3]  ;;  %v504_v41 = vsub.s32 1, %v499_v38 }
   0xf   : > { %s194_s5 = scalar_lea.vmem %s840_s0, %s612_s28  ;;  %v501_v42 = vrot.slane %v496_v40, %v500_v39  ;;  %s645_s24 = sshll.u32 %s846_s19, 4 }
  0x10   : > { %v204_v8 = vld [vmem:[%s194_s5] sm:$0xff]  ;;  %v205_v9 = vld [vmem:[%s194_s5 + $0x8] sm:$0xff]  ;;  %351 = vmatpush1.bf16.msra.mxu0 %v671_v6  ;;  %305 = vmatpush1.bf16.msra.mxu1 %v671_v6  ;;  %v505_v44 = vrot.slane %v496_v40, %v504_v41  ;;  %s201_s27 = scalar_lea.vmem %s844_s4, %s645_s24 }
  0x11   : > { %352 = vmatprep.subr.bf16.mxu0 %v672_v7  ;;  %v206_v12 = vpack.c.bf16 %v205_v9, %v204_v8  ;;  %306 = vmatprep.subr.bf16.mxu1 %v672_v7 }
  0x13   : > { %v207_v13 = vunpack.c.l.bf16 %v206_v12  ;;  %v208_v14 = vunpack.c.h.bf16 %v206_v12 }
  0x14   : > { %353 = vmatpush1.bf16.msra.mxu0 %v674_v10  ;;  %307 = vmatpush1.bf16.msra.mxu1 %v674_v10 }
  0x15   : > { %354 = vmatprep.subr.bf16.mxu0 %v675_v11  ;;  %308 = vmatprep.subr.bf16.mxu1 %v675_v11  ;;  %v209_v17 = vsub.f32 %v204_v8, %v207_v13  ;;  %v210_v18 = vsub.f32 %v205_v9, %v208_v14 }
  0x17   : > { %v211_v21 = vpack.c.bf16 %v210_v18, %v209_v17 }
  0x18   : > { %355 = vmatpush1.bf16.msra.mxu0 %v677_v15  ;;  %309 = vmatpush1.bf16.msra.mxu1 %v677_v15 }
  0x19   : > { %356 = vmatprep.subr.bf16.mxu0 %v678_v16  ;;  %310 = vmatprep.subr.bf16.mxu1 %v678_v16 }
  0x1c   : > { %357 = vmatpush1.bf16.msra.mxu0 %v680_v19  ;;  %311 = vmatpush1.bf16.msra.mxu1 %v680_v19 }
  0x1d   : > { %449 = vmatprep.subr.bf16.mxu0 %v683_v20 }
  0x1f   : > { %629 = vmatmul.mubr.msk.bf16.vlgmr.msra.gmra.mrb[0].mxu0 %vm296_vm0, %v206_v12  ;;  %628 = vmatmul.mubr.msk.bf16.vlgmr.msra.gmra.mrb[0].mxu1 %vm296_vm0, %v211_v21 }
  0x20   : > { %450 = vmatpush1.bf16.msra.mxu0 %v681_v22  ;;  %481 = vmatprep.mubr.bf16.mxu0 %v715_v2 }
  0x21   : > { %451 = vmatprep.subr.bf16.mxu0 %v686_v23 }
  0x24   : > { %452 = vmatpush1.bf16.msra.mxu0 %v684_v24 }
  0x25   : > { %453 = vmatprep.subr.bf16.mxu0 %v689_v25 }
  0x28   : > { %454 = vmatpush1.bf16.msra.mxu0 %v687_v26 }
  0x29   : > { %455 = vmatprep.subr.bf16.mxu0 %v692_v27 }
  0x2c   : > { %456 = vmatpush1.bf16.msra.mxu0 %v690_v28 }
  0x2d   : > { %457 = vmatprep.subr.bf16.mxu0 %v695_v29 }
  0x30   : > { %458 = vmatpush1.bf16.msra.mxu0 %v693_v30 }
  0x31   : > { %459 = vmatprep.subr.bf16.mxu0 %v698_v31 }
  0x34   : > { %460 = vmatpush1.bf16.msra.mxu0 %v696_v32 }
  0x37   : > { %642 = vmatmul.mubr.msk.bf16.vlgmr.msra.gmra.mrb[0].mxu0 %vm296_vm0, %v206_v12 }
  0xf2   : > { %v334_v33 = vpop.f32.mrb[0].mxu1 }
  0xf3   : > { %v336_v34 = vpop.f32.mrb[1].mxu1 }
  0xf4   : > { %v338_v35 = vpop.f32.mrb[2].mxu1 }
  0xf5   : > { %v340_v36 = vpop.f32.mrb[3].mxu1 }
 0x10a   : > { %v483_v43 = vpop.f32.mrb[0].mxu0 }
 0x10b   : > { %v646_v45 = vadd.f32 %v483_v43, %v334_v33  ;;  %v485_v46 = vpop.f32.mrb[1].mxu0 }
 0x10c   : > { %v647_v47 = vadd.f32 %v485_v46, %v336_v34  ;;  %v487_v48 = vpop.f32.mrb[2].mxu0 }
 0x10d   : > { %v508_v49 = vadd.f32 %v646_v45, %v501_v42  ;;  %v648_v50 = vadd.f32 %v487_v48, %v338_v35  ;;  %v489_v51 = vpop.f32.mrb[3].mxu0 }
 0x10e   : > { %v509_v52 = vadd.f32 %v647_v47, %v505_v44  ;;  %v649_v53 = vadd.f32 %v489_v51, %v340_v36 }
 0x10f   : > { %v516_v54 = vmul.f32 %v508_v49, %v508_v49  ;;  %v510_v55 = vadd.f32 %v648_v50, %v501_v42  ;;  %v512_v10 = vmul.f32 0.5, %v508_v49 }
 0x110   : > { %v517_v56 = vmul.f32 %v509_v52, %v509_v52  ;;  %v511_v57 = vadd.f32 %v649_v53, %v505_v44  ;;  %v513_v13 = vmul.f32 0.5, %v509_v52 }
 0x111   : > { %v520_v58 = vmul.f32 0.035677407, %v516_v54  ;;  %v518_v59 = vmul.f32 %v510_v55, %v510_v55  ;;  %v514_v17 = vmul.f32 0.5, %v510_v55 }
 0x112   : > { %v521_v60 = vmul.f32 0.035677407, %v517_v56  ;;  %v519_v61 = vmul.f32 %v511_v57, %v511_v57  ;;  %v515_v20 = vmul.f32 0.5, %v511_v57 }
 0x113   : > { %v524_v62 = vadd.f32 0.3989423, %v520_v58  ;;  %v522_v63 = vmul.f32 0.035677407, %v518_v59 }
 0x114   : > { %v525_v0 = vadd.f32 0.3989423, %v521_v60  ;;  %v523_v1 = vmul.f32 0.035677407, %v519_v61 }
 0x115   : > { %v528_v2 = vmul.f32 %v524_v62, %v508_v49  ;;  %v526_v3 = vadd.f32 0.3989423, %v522_v63 }
 0x116   : > { %v529_v4 = vmul.f32 %v525_v0, %v509_v52  ;;  %v527_v5 = vadd.f32 0.3989423, %v523_v1 }
 0x117   : > { %699 = vtanh.f32 %v528_v2  ;;  %v530_v6 = vmul.f32 %v526_v3, %v510_v55 }
 0x118   : > { %701 = vtanh.f32 %v529_v4  ;;  %v531_v7 = vmul.f32 %v527_v5, %v511_v57 }
 0x119   : > { %703 = vtanh.f32 %v530_v6 }
 0x11a   : > { %705 = vtanh.f32 %v531_v7 }
 0x121   : > { %v700_v8 = vpop.eup %699 }
 0x122   : > { %v702_v9 = vpop.eup %701  ;;  %v536_v11 = vadd.f32 1.0, %v700_v8 }
 0x123   : > { %v704_v12 = vpop.eup %703  ;;  %v537_v14 = vadd.f32 1.0, %v702_v9 }
 0x124   : > { %v706_v15 = vpop.eup %705  ;;  %v540_v16 = vmul.f32 %v536_v11, %v512_v10  ;;  %v538_v18 = vadd.f32 1.0, %v704_v12 }
 0x125   : > { %v541_v19 = vmul.f32 %v537_v14, %v513_v13  ;;  %v539_v21 = vadd.f32 1.0, %v706_v15 }
 0x126   : > { %544 = vst [vmem:[%s201_s27] sm:$0xff] %v540_v16  ;;  %v542_v22 = vmul.f32 %v538_v18, %v514_v17 }
 0x127   : > { %545 = vst [vmem:[%s201_s27 + $0x8] sm:$0xff] %v541_v19  ;;  %v543_v23 = vmul.f32 %v539_v21, %v515_v20 }
 0x128   : > { %546 = vst [vmem:[%s201_s27 + $0x10] sm:$0xff] %v542_v22 }
 0x129   : > { %547 = vst [vmem:[%s201_s27 + $0x18] sm:$0xff] %v543_v23 }
 0x12a PF: > { %s14_s15 = sadd.s32 1, %s713_s15  }
 0x12b   : > { %p11_p4 = scmp.ge.s32.totalorder %s14_s15, 4  }
 0x12d   :  { %13 = sbr.rel (!%p11_p4) target bundleno = 1 (0x1), region = 66 }

</bundles_post_ra>
